<compile_context>
chip_gen: v7x
topology: tpu7x:2x2x1
jax: 0.10.0
libtpu: 0.0.40
codegen_flags: <defaults>
</compile_context>

<pallas_src>
import math

import jax
import jax.numpy as jnp
from jax.experimental import pallas as pl
from jax.experimental.pallas import tpu as pltpu


# ---------------------------------------------------------------------------
# Pallas kernel: 3-layer MLP + tanh squash + scaled Gaussian noise.
# All tensors are in [features, batch] (lane-dense) layout.
# ---------------------------------------------------------------------------
def actor_kernel(xT_ref, w1T_ref, b1T_ref, w2T_ref, b2T_ref,
                 waT_ref, baT_ref, scaleT_ref, biasT_ref, noiseT_ref,
                 policyT_ref):
    xT = xT_ref[...]                                                  # bf16 [in, tb]

    h1 = jnp.dot(w1T_ref[...], xT,
                 preferred_element_type=jnp.float32) + b1T_ref[...]  # [units, tb] f32
    h1 = jnp.maximum(h1, 0.01 * h1)                                  # LeakyReLU(0.01)

    h2 = jnp.dot(w2T_ref[...], h1.astype(jnp.bfloat16),
                 preferred_element_type=jnp.float32) + b2T_ref[...]
    h2 = jnp.maximum(h2, 0.01 * h2)

    model_out = jnp.dot(waT_ref[...], h2.astype(jnp.bfloat16),
                        preferred_element_type=jnp.float32) + baT_ref[...]   # [A, tb]

    scale = scaleT_ref[...]                                           # [A, 1]
    policyT = jnp.tanh(model_out) * scale + biasT_ref[...]
    policyT_ref[...] = policyT + scale * noiseT_ref[...] * (1.0 / 20.0)


# ---------------------------------------------------------------------------
# Wrapper: grid over batch (lane axis), resident weights, bf16 MXU inputs.
# ---------------------------------------------------------------------------
def openai_actor_forward(x, params, noise_key, *, tile_b=512):
    """x: [B, num_inputs] f32.  Returns (policy [B, A] f32, noise [B, A] f32)."""
    w1, b1, w2, b2, wa, ba, scale, bias = params
    B, num_inputs = x.shape
    num_units = w1.shape[1]
    A = wa.shape[1]

    # Pad batch to a multiple of the tile (sliced off at the end).
    Bp = pl.cdiv(B, tile_b) * tile_b
    if Bp != B:
        x = jnp.pad(x, ((0, Bp - B), (0, 0)))

    # [features, batch] layouts; bf16 MXU operands (f32 accumulation in-kernel).
    xT = x.T.astype(jnp.bfloat16)                     # [in, Bp]
    w1T = w1.T.astype(jnp.bfloat16)                   # [units, in]
    w2T = w2.T.astype(jnp.bfloat16)                   # [units, units]
    waT = wa.T.astype(jnp.bfloat16)                   # [A, units]
    b1T = b1.reshape(num_units, 1)
    b2T = b2.reshape(num_units, 1)
    baT = ba.reshape(A, 1)
    scaleT = scale.reshape(A, 1)
    biasT = bias.reshape(A, 1)

    # Exploration noise ~ N(0,1) (torch.randn_like equivalent), lane-dense.
    noiseT = jax.random.normal(noise_key, (A, Bp), jnp.float32)

    grid = (Bp // tile_b,)
    const = lambda i: (0, 0)          # weights / biases stay VMEM-resident
    batch_map = lambda i: (0, i)      # batch tiled along the lane axis

    flops = 2 * Bp * (num_inputs * num_units + num_units * num_units + num_units * A)
    bytes_accessed = int(
        xT.size * 2 + 2 * A * Bp * 4
        + (w1T.size + w2T.size + waT.size) * 2
        + (b1T.size + b2T.size + baT.size + scaleT.size + biasT.size) * 4)
    cost = pl.CostEstimate(flops=int(flops),
                           transcendentals=int(Bp * A),
                           bytes_accessed=bytes_accessed)

    policyT = pl.pallas_call(
        actor_kernel,
        grid=grid,
        in_specs=[
            pl.BlockSpec((num_inputs, tile_b), batch_map),   # x^T tile
            pl.BlockSpec(w1T.shape, const),
            pl.BlockSpec(b1T.shape, const),
            pl.BlockSpec(w2T.shape, const),
            pl.BlockSpec(b2T.shape, const),
            pl.BlockSpec(waT.shape, const),
            pl.BlockSpec(baT.shape, const),
            pl.BlockSpec(scaleT.shape, const),
            pl.BlockSpec(biasT.shape, const),
            pl.BlockSpec((A, tile_b), batch_map),            # noise tile
        ],
        out_specs=pl.BlockSpec((A, tile_b), batch_map),      # policy tile (lane-dense)
        out_shape=jax.ShapeDtypeStruct((A, Bp), jnp.float32),
        compiler_params=pltpu.CompilerParams(dimension_semantics=("parallel",)),
        cost_estimate=cost,
    )(xT, w1T, b1T, w2T, b2T, waT, baT, scaleT, biasT, noiseT)

    return policyT[:, :B].T, noiseT[:, :B].T


# ---------------------------------------------------------------------------
# Deterministic parameter init matching the PyTorch module.
# ---------------------------------------------------------------------------
def xavier_uniform(key, fan_in, fan_out, gain):
    # Returns [fan_in, fan_out] (already transposed for x @ W).
    bound = gain * math.sqrt(6.0 / (fan_in + fan_out))
    return jax.random.uniform(key, (fan_in, fan_out), jnp.float32, -bound, bound)


def linear_bias(key, fan_in, fan_out):
    # nn.Linear default bias init: U(-1/sqrt(fan_in), 1/sqrt(fan_in)).
    bound = 1.0 / math.sqrt(fan_in)
    return jax.random.uniform(key, (1, fan_out), jnp.float32, -bound, bound)


def make_params(key, num_inputs, num_units, action_size, action_low, action_high):
    gain = math.sqrt(2.0 / (1.0 + 0.01 ** 2))   # calculate_gain('leaky_relu')
    ks = jax.random.split(key, 6)
    w1 = xavier_uniform(ks[0], num_inputs, num_units, gain)
    b1 = linear_bias(ks[1], num_inputs, num_units)
    w2 = xavier_uniform(ks[2], num_units, num_units, gain)
    b2 = linear_bias(ks[3], num_units, num_units)
    wa = xavier_uniform(ks[4], num_units, action_size, gain)
    ba = linear_bias(ks[5], num_units, action_size)
    scale = ((action_high - action_low) / 2.0).reshape(1, action_size).astype(jnp.float32)
    bias = ((action_high + action_low) / 2.0).reshape(1, action_size).astype(jnp.float32)
    return (w1, b1, w2, b2, wa, ba, scale, bias)


# ---------------------------------------------------------------------------
# Reference: same math (bf16 operands, f32 accumulation), deterministic part.
# ---------------------------------------------------------------------------
def ref_forward_det(x, params):
    w1, b1, w2, b2, wa, ba, scale, bias = params
    bf = lambda a: a.astype(jnp.bfloat16).astype(jnp.float32)
    hp = jax.lax.Precision.HIGHEST
    h1 = jnp.dot(bf(x), bf(w1), precision=hp) + b1
    h1 = jnp.where(h1 > 0, h1, 0.01 * h1)
    h2 = jnp.dot(bf(h1), bf(w2), precision=hp) + b2
    h2 = jnp.where(h2 > 0, h2, 0.01 * h2)
    model_out = jnp.dot(bf(h2), bf(wa), precision=hp) + ba
    return jnp.tanh(model_out) * scale + bias


if __name__ == "__main__":
    batch = 1024             # grid of 2 tiles -> both v7x TensorCores usable
    num_inputs = 32          # observation dim
    num_units_openai = 64    # args.num_units_openai
    action_size = 4
    TILE_B = 512

    key = jax.random.PRNGKey(0)
    k_param, k_x, k_noise = jax.random.split(key, 3)

    action_low = -2.0 * jnp.ones((action_size,), jnp.float32)
    action_high = 2.0 * jnp.ones((action_size,), jnp.float32)

    params = make_params(k_param, num_inputs, num_units_openai, action_size,
                         action_low, action_high)
    x = jax.random.normal(k_x, (batch, num_inputs), jnp.float32)

    policy, noise = openai_actor_forward(x, params, k_noise, tile_b=TILE_B)
    jax.block_until_ready(policy)

    # --- correctness checks -------------------------------------------------
    scale = params[6]
    det_ref = ref_forward_det(x, params)
    expected = det_ref + scale * noise / 20.0
    assert jnp.allclose(policy, expected, atol=5e-3, rtol=5e-3), \
        "kernel policy does not match reference MLP + tanh squash + noise"

    # Noise sanity: finite, ~N(0,1) over batch*action samples.
    assert bool(jnp.all(jnp.isfinite(noise)))
    assert abs(float(noise.mean())) < 0.2
    assert 0.7 < float(noise.std()) < 1.3

    print("KERNEL_OK")
</pallas_src>

<mosaic_0001>
module attributes {stable_mosaic.version = 11 : i64} {
  func.func @actor_kernel(%arg0: i32, %arg1: memref<32x512xbf16, #tpu.memory_space<vmem>>, %arg2: memref<64x32xbf16, #tpu.memory_space<vmem>>, %arg3: memref<64x1xf32, #tpu.memory_space<vmem>>, %arg4: memref<64x64xbf16, #tpu.memory_space<vmem>>, %arg5: memref<64x1xf32, #tpu.memory_space<vmem>>, %arg6: memref<4x64xbf16, #tpu.memory_space<vmem>>, %arg7: memref<4x1xf32, #tpu.memory_space<vmem>>, %arg8: memref<4x1xf32, #tpu.memory_space<vmem>>, %arg9: memref<4x1xf32, #tpu.memory_space<vmem>>, %arg10: memref<4x512xf32, #tpu.memory_space<vmem>>, %arg11: memref<4x512xf32, #tpu.memory_space<vmem>>) attributes {dimension_semantics = [#tpu.dimension_semantics<parallel>], iteration_bounds = array<i64: 2>, scalar_prefetch = 0 : i64, scratch_operands = 0 : i64, tpu.core_type = #tpu.core_type<tc>, window_params = [{transform_indices = @transform_0, window_bounds = array<i64: 32, 512>}, {pipeline_mode = #tpu.pipeline_mode<synchronous>, transform_indices = @transform_1, window_bounds = array<i64: 64, 32>}, {pipeline_mode = #tpu.pipeline_mode<synchronous>, transform_indices = @transform_2, window_bounds = array<i64: 64, 1>}, {pipeline_mode = #tpu.pipeline_mode<synchronous>, transform_indices = @transform_3, window_bounds = array<i64: 64, 64>}, {pipeline_mode = #tpu.pipeline_mode<synchronous>, transform_indices = @transform_4, window_bounds = array<i64: 64, 1>}, {pipeline_mode = #tpu.pipeline_mode<synchronous>, transform_indices = @transform_5, window_bounds = array<i64: 4, 64>}, {pipeline_mode = #tpu.pipeline_mode<synchronous>, transform_indices = @transform_6, window_bounds = array<i64: 4, 1>}, {pipeline_mode = #tpu.pipeline_mode<synchronous>, transform_indices = @transform_7, window_bounds = array<i64: 4, 1>}, {pipeline_mode = #tpu.pipeline_mode<synchronous>, transform_indices = @transform_8, window_bounds = array<i64: 4, 1>}, {transform_indices = @transform_9, window_bounds = array<i64: 4, 512>}, {transform_indices = @transform_10, window_bounds = array<i64: 4, 512>}]} {
    %c0 = arith.constant 0 : index
    %c0_0 = arith.constant 0 : index
    %0 = vector.load %arg1[%c0, %c0_0] : memref<32x512xbf16, #tpu.memory_space<vmem>>, vector<32x512xbf16>
    %c0_1 = arith.constant 0 : index
    %c0_2 = arith.constant 0 : index
    %1 = vector.load %arg2[%c0_1, %c0_2] : memref<64x32xbf16, #tpu.memory_space<vmem>>, vector<64x32xbf16>
    %cst = arith.constant dense<0.000000e+00> : vector<64x512xf32>
    %2 = tpu.matmul %1, %0, %cst {dimension_numbers = #tpu.dot_dimension_numbers<[1], [0], [0], [1], [0, 0, 1, 1], [], []>} : vector<64x32xbf16>, vector<32x512xbf16>, vector<64x512xf32> -> vector<64x512xf32>
    %c0_3 = arith.constant 0 : index
    %c0_4 = arith.constant 0 : index
    %3 = vector.load %arg3[%c0_3, %c0_4] : memref<64x1xf32, #tpu.memory_space<vmem>>, vector<64x1xf32>
    %4 = vector.broadcast %3 : vector<64x1xf32> to vector<64x512xf32>
    %5 = arith.addf %2, %4 : vector<64x512xf32>
    %cst_5 = arith.constant 0.00999999977 : f32
    %6 = vector.broadcast %cst_5 : f32 to vector<64x512xf32>
    %7 = arith.mulf %6, %5 : vector<64x512xf32>
    %8 = arith.maximumf %5, %7 : vector<64x512xf32>
    %c0_6 = arith.constant 0 : index
    %c0_7 = arith.constant 0 : index
    %9 = vector.load %arg4[%c0_6, %c0_7] : memref<64x64xbf16, #tpu.memory_space<vmem>>, vector<64x64xbf16>
    %10 = arith.truncf %8 : vector<64x512xf32> to vector<64x512xbf16>
    %cst_8 = arith.constant dense<0.000000e+00> : vector<64x512xf32>
    %11 = tpu.matmul %9, %10, %cst_8 {dimension_numbers = #tpu.dot_dimension_numbers<[1], [0], [0], [1], [0, 0, 1, 1], [], []>} : vector<64x64xbf16>, vector<64x512xbf16>, vector<64x512xf32> -> vector<64x512xf32>
    %c0_9 = arith.constant 0 : index
    %c0_10 = arith.constant 0 : index
    %12 = vector.load %arg5[%c0_9, %c0_10] : memref<64x1xf32, #tpu.memory_space<vmem>>, vector<64x1xf32>
    %13 = vector.broadcast %12 : vector<64x1xf32> to vector<64x512xf32>
    %14 = arith.addf %11, %13 : vector<64x512xf32>
    %cst_11 = arith.constant 0.00999999977 : f32
    %15 = vector.broadcast %cst_11 : f32 to vector<64x512xf32>
    %16 = arith.mulf %15, %14 : vector<64x512xf32>
    %17 = arith.maximumf %14, %16 : vector<64x512xf32>
    %c0_12 = arith.constant 0 : index
    %c0_13 = arith.constant 0 : index
    %18 = vector.load %arg6[%c0_12, %c0_13] : memref<4x64xbf16, #tpu.memory_space<vmem>>, vector<4x64xbf16>
    %19 = arith.truncf %17 : vector<64x512xf32> to vector<64x512xbf16>
    %cst_14 = arith.constant dense<0.000000e+00> : vector<4x512xf32>
    %20 = tpu.matmul %18, %19, %cst_14 {dimension_numbers = #tpu.dot_dimension_numbers<[1], [0], [0], [1], [0, 0, 1, 1], [], []>} : vector<4x64xbf16>, vector<64x512xbf16>, vector<4x512xf32> -> vector<4x512xf32>
    %c0_15 = arith.constant 0 : index
    %c0_16 = arith.constant 0 : index
    %21 = vector.load %arg7[%c0_15, %c0_16] : memref<4x1xf32, #tpu.memory_space<vmem>>, vector<4x1xf32>
    %22 = vector.broadcast %21 : vector<4x1xf32> to vector<4x512xf32>
    %23 = arith.addf %20, %22 : vector<4x512xf32>
    %c0_17 = arith.constant 0 : index
    %c0_18 = arith.constant 0 : index
    %24 = vector.load %arg8[%c0_17, %c0_18] : memref<4x1xf32, #tpu.memory_space<vmem>>, vector<4x1xf32>
    %25 = math.tanh %23 : vector<4x512xf32>
    %26 = vector.broadcast %24 : vector<4x1xf32> to vector<4x512xf32>
    %27 = arith.mulf %25, %26 : vector<4x512xf32>
    %c0_19 = arith.constant 0 : index
    %c0_20 = arith.constant 0 : index
    %28 = vector.load %arg9[%c0_19, %c0_20] : memref<4x1xf32, #tpu.memory_space<vmem>>, vector<4x1xf32>
    %29 = vector.broadcast %28 : vector<4x1xf32> to vector<4x512xf32>
    %30 = arith.addf %27, %29 : vector<4x512xf32>
    %c0_21 = arith.constant 0 : index
    %c0_22 = arith.constant 0 : index
    %31 = vector.load %arg10[%c0_21, %c0_22] : memref<4x512xf32, #tpu.memory_space<vmem>>, vector<4x512xf32>
    %32 = vector.broadcast %24 : vector<4x1xf32> to vector<4x512xf32>
    %33 = arith.mulf %32, %31 : vector<4x512xf32>
    %cst_23 = arith.constant 5.000000e-02 : f32
    %34 = vector.broadcast %cst_23 : f32 to vector<4x512xf32>
    %35 = arith.mulf %33, %34 : vector<4x512xf32>
    %36 = arith.addf %30, %35 : vector<4x512xf32>
    %c0_24 = arith.constant 0 : index
    %c0_25 = arith.constant 0 : index
    %37 = vector.load %arg11[%c0_24, %c0_25] : memref<4x512xf32, #tpu.memory_space<vmem>>, vector<4x512xf32>
    tpu.vector_store %arg11[%c0_24, %c0_25], %36 {strides = array<i32>} : memref<4x512xf32, #tpu.memory_space<vmem>>, vector<4x512xf32>,
    return
  }
  func.func @transform_0(%arg0: i32) -> (i32, i32) {
    %c0_i32 = arith.constant 0 : i32
    %c0_i32_0 = arith.constant 0 : i32
    return %c0_i32, %arg0 : i32, i32
  }
  func.func @transform_1(%arg0: i32) -> (i32, i32) {
    %c0_i32 = arith.constant 0 : i32
    %c0_i32_0 = arith.constant 0 : i32
    %c0_i32_1 = arith.constant 0 : i32
    return %c0_i32, %c0_i32_0 : i32, i32
  }
  func.func @transform_2(%arg0: i32) -> (i32, i32) {
    %c0_i32 = arith.constant 0 : i32
    %c0_i32_0 = arith.constant 0 : i32
    %c0_i32_1 = arith.constant 0 : i32
    return %c0_i32, %c0_i32_0 : i32, i32
  }
  func.func @transform_3(%arg0: i32) -> (i32, i32) {
    %c0_i32 = arith.constant 0 : i32
    %c0_i32_0 = arith.constant 0 : i32
    %c0_i32_1 = arith.constant 0 : i32
    return %c0_i32, %c0_i32_0 : i32, i32
  }
  func.func @transform_4(%arg0: i32) -> (i32, i32) {
    %c0_i32 = arith.constant 0 : i32
    %c0_i32_0 = arith.constant 0 : i32
    %c0_i32_1 = arith.constant 0 : i32
    return %c0_i32, %c0_i32_0 : i32, i32
  }
  func.func @transform_5(%arg0: i32) -> (i32, i32) {
    %c0_i32 = arith.constant 0 : i32
    %c0_i32_0 = arith.constant 0 : i32
    %c0_i32_1 = arith.constant 0 : i32
    return %c0_i32, %c0_i32_0 : i32, i32
  }
  func.func @transform_6(%arg0: i32) -> (i32, i32) {
    %c0_i32 = arith.constant 0 : i32
    %c0_i32_0 = arith.constant 0 : i32
    %c0_i32_1 = arith.constant 0 : i32
    return %c0_i32, %c0_i32_0 : i32, i32
  }
  func.func @transform_7(%arg0: i32) -> (i32, i32) {
    %c0_i32 = arith.constant 0 : i32
    %c0_i32_0 = arith.constant 0 : i32
    %c0_i32_1 = arith.constant 0 : i32
    return %c0_i32, %c0_i32_0 : i32, i32
  }
  func.func @transform_8(%arg0: i32) -> (i32, i32) {
    %c0_i32 = arith.constant 0 : i32
    %c0_i32_0 = arith.constant 0 : i32
    %c0_i32_1 = arith.constant 0 : i32
    return %c0_i32, %c0_i32_0 : i32, i32
  }
  func.func @transform_9(%arg0: i32) -> (i32, i32) {
    %c0_i32 = arith.constant 0 : i32
    %c0_i32_0 = arith.constant 0 : i32
    return %c0_i32, %arg0 : i32, i32
  }
  func.func @transform_10(%arg0: i32) -> (i32, i32) {
    %c0_i32 = arith.constant 0 : i32
    %c0_i32_0 = arith.constant 0 : i32
    return %c0_i32, %arg0 : i32, i32
  }
}

</mosaic_0001>

<bundles_post_ra>
// kernel: tpu_custom_call.1
= control target key start
LH: loop header
LB: loop body
LE: loop exit
PB: predicated region body
PF: predicated region fallthrough
CT: control target
= control target key end

     0   :  { %15 = vsyncpa [#allocation4], 0  ;;  %s1814_s0 = inlined_call_operand.vmem [shape: bf16[32,1024], index: 0, kind: input, shape index: {}]   ;;  %s1815_s1 = inlined_call_operand.vmem [shape: bf16[64,32], index: 1, kind: input, shape index: {}]   ;;  %s1816_s2 = inlined_call_operand.vmem [shape: f32[64,1], index: 2, kind: input, shape index: {}]   ;;  %s1817_s3 = inlined_call_operand.vmem [shape: bf16[64,64], index: 3, kind: input, shape index: {}]   ;;  %s1818_s4 = inlined_call_operand.vmem [shape: f32[64,1], index: 4, kind: input, shape index: {}]   ;;  %s1819_s5 = inlined_call_operand.vmem [shape: bf16[4,64], index: 5, kind: input, shape index: {}]   ;;  %s1820_s6 = inlined_call_operand.vmem [shape: f32[4,1], index: 6, kind: input, shape index: {}]   ;;  %s1821_s7 = inlined_call_operand.vmem [shape: f32[4,1], index: 7, kind: input, shape index: {}]   ;;  %s1822_s8 = inlined_call_operand.vmem [shape: f32[4,1], index: 8, kind: input, shape index: {}]   ;;  %s1823_s9 = inlined_call_operand.vmem [shape: f32[4,1024], index: 9, kind: input, shape index: {}]   ;;  %s1824_s10 = inlined_call_operand.hbm [shape: f32[4,1024], index: 10, kind: output, shape index: {}]  }
   0x1   :  { %17 = vsyncpa [#allocation4 + $0x1], 0  ;;  %s1578_s13 = smov 0   ;;  %s1580_s14 = smov 0  }
   0x2   :  { %s1582_s15 = smov 0   ;;  %s1584_s16 = smov 0  }
   0x3 LB: > { %s1599_s17 = sadd.s32 4294967295, %s1519_s16   ;;  %s1333_s18 = sadd.s32 4294967294, %s1519_s16   ;;  %s1519_s16 = sphi %s1584_s16, %s1830_s16   ;;  %s1515_s15 = sphi %s1582_s15, %s1829_s15   ;;  %s1511_s14 = sphi %s1580_s14, %s1828_s14   ;;  %s1507_s13 = sphi %s1578_s13, %s1827_s13  }
   0x4   : > { %s1603_s19 = sadd.s32 1, %s1519_s16   ;;  %s30_s20 = sadd.s32 1, %s1515_s15 }
   0x5   : > { %s27_s21 = ssub.s32 %s1519_s16, %s1603_s19  ;;  %p37_p0 = scmp.ne.s32.totalorder %s1515_s15, %s1511_s14 }
   0x6   : > { %p28_p1 = scmp.eq.s32.totalorder %s27_s21, 0  ;;  %p38_p2 = scmp.eq.s32.totalorder %s1519_s16, 0 }
   0x7   : > { %p261_p3 = scmp.eq.s32.totalorder %s1599_s17, 1  ;;  %p266_p4 = scmp.ne.s32.totalorder %s1511_s14, %s1507_s13 }
   0x8   : > { %s1615_s22 = scalar_select %p28_p1, %s1515_s15, %s30_s20  }
   0x9   : > { %p39_p5 = por %p38_p2, %p37_p0  ;;  %p1617_p6 = por %p261_p3, %p37_p0 }
   0xa   : > { %p267_p7 = scmp.eq.s32.totalorder %s1333_s18, 1  ;;  %p1335_p9 = scmp.ge.s32.totalorder %s1519_s16, 2 }
   0xc   : > { %p1621_p8 = por %p267_p7, %p266_p4  ;;  %307 = sbr.rel (%p1335_p9) target bundleno = 27 (0x1b), region = 48 }
  0x13   : > { %310 = sbr.rel (!%p39_p5) target bundleno = 27 (0x1b), region = 52  ;;  %s312_s25 = sand.u32 (%p39_p5), 1, %s1515_s15  }
  0x14   : > { %s1383_s26 = sshll.u32 (%p39_p5), %s1519_s16, 4  ;;  %s1336_s27 = sshll.u32 (%p39_p5), %s312_s25, 6 }
  0x15   : > { %s317_s30 = scalar_lea.vmem (%p39_p5), %s1814_s0, %s1383_s26  ;;  %s314_s11 = scalar_lea.vmem (%p39_p5), [#allocation2], %s1336_s27 }
  0x16   : > { %v330_v0 = vld [vmem:[%s317_s30] sm:$0xff] (%p39_p5)  ;;  %v332_v1 = vld [vmem:[%s317_s30 + $0x8] sm:$0xff] (%p39_p5) }
  0x17   : > { %v334_v2 = vld [vmem:[%s317_s30 + $0x20] sm:$0xff] (%p39_p5)  ;;  %331 = vst [vmem:[%s314_s11] sm:$0xff] (%p39_p5), %v330_v0  ;;  %333 = vst [vmem:[%s314_s11 + $0x8] sm:$0xff] (%p39_p5), %v332_v1  ;;  %v336_v3 = vld [vmem:[%s317_s30 + $0x28] sm:$0xff] (%p39_p5) }
  0x18   : > { %335 = vst [vmem:[%s314_s11 + $0x10] sm:$0xff] (%p39_p5), %v334_v2  ;;  %v338_v4 = vld [vmem:[%s317_s30 + $0x40] sm:$0xff] (%p39_p5)  ;;  %v340_v5 = vld [vmem:[%s317_s30 + $0x48] sm:$0xff] (%p39_p5)  ;;  %337 = vst [vmem:[%s314_s11 + $0x18] sm:$0xff] (%p39_p5), %v336_v3 }
  0x19   : > { %339 = vst [vmem:[%s314_s11 + $0x20] sm:$0xff] (%p39_p5), %v338_v4  ;;  %341 = vst [vmem:[%s314_s11 + $0x28] sm:$0xff] (%p39_p5), %v340_v5  ;;  %v342_v6 = vld [vmem:[%s317_s30 + $0x60] sm:$0xff] (%p39_p5)  ;;  %v344_v7 = vld [vmem:[%s317_s30 + $0x68] sm:$0xff] (%p39_p5) }
  0x1a   : > { %343 = vst [vmem:[%s314_s11 + $0x30] sm:$0xff] %v342_v6  ;;  %345 = vst [vmem:[%s314_s11 + $0x38] sm:$0xff] %v344_v7 }
  0x1b PF: > { %p1339_p10 = scmp.ge.s32.totalorder %s1519_s16, 1  ;;  %p359_p11 = scmp.lt.s32.totalorder %s1519_s16, 3 }
  0x1d   : > { %p360_p12 = pnand %p1339_p10, %p359_p11 }
  0x1e   : > { %s1636_s12 = sand.u32 (!%p360_p12), 1, %s1511_s14   ;;  %v1521_v8 = vmov (!%p360_p12), 0   ;;  %v433_v17 = vld [vmem:[%s1816_s2] sm:$0xff] (!%p360_p12)  ;;  %v435_v19 = vld [vmem:[%s1816_s2 + $0x10] sm:$0xff] (!%p360_p12)  ;;  %vm541_vm0 = vcmask (!%p360_p12), 261120   ;;  %v434_v20 = vld [vmem:[%s1816_s2 + $0x8] sm:$0xff] (!%p360_p12) }
  0x1f   : > { %363 = sbr.rel (%p360_p12) target bundleno = 794 (0x31a), region = 79  ;;  %s1340_s18 = sshll.u32 (!%p360_p12), %s1636_s12, 6  ;;  %586 = vmatprep.mubr.bf16.mxu0 (!%p360_p12), %v1521_v8  ;;  %659 = vmatprep.mubr.bf16.mxu1 (!%p360_p12), %v1521_v8  ;;  %v1439_v18 = vld [vmem:[%s1815_s1] sm:$0xff] (!%p360_p12)   ;;  %v436_v21 = vld [vmem:[%s1816_s2 + $0x18] sm:$0xff] (!%p360_p12)  ;;  %v438_v23 = vld [vmem:[%s1816_s2 + $0x28] sm:$0xff] (!%p360_p12)  ;;  %vm856_vm1 = vcmask (!%p360_p12), 523264  }
  0x20   : > { %1425 = vset.pattern.permute.xlu0 (!%p360_p12), %v1521_v8  ;;  %1426 = vset.pattern.permute.xlu1 (!%p360_p12), %v1521_v8  ;;  %s368_s20 = scalar_lea.vmem (!%p360_p12), [#allocation2], %s1340_s18  ;;  %v437_v22 = vld [vmem:[%s1816_s2 + $0x20] sm:$0xff] (!%p360_p12)  ;;  %v1440_v24 = vld [vmem:[%s1815_s1 + $0x8] sm:$0xff] (!%p360_p12)   ;;  %v439_v25 = vld [vmem:[%s1816_s2 + $0x30] sm:$0xff] (!%p360_p12)  ;;  %s1342_s30 = sshll.u32 (!%p360_p12), %s1599_s17, 2 }
  0x21   : > { %v1427_v9 = vld [vmem:[%s368_s20 + $0x4] ss:$16 sps:$4 sm:$0xff] (!%p360_p12)   ;;  %v1429_v10 = vld [vmem:[%s368_s20 + $0xc] ss:$16 sps:$4 sm:$0xff] (!%p360_p12)   ;;  %v1431_v11 = vld [vmem:[%s368_s20] ss:$16 sps:$4 sm:$0xff] (!%p360_p12)   ;;  %443 = vperm.xlu0 (!%p360_p12), %1425, %v433_v17   ;;  %453 = vperm.xlu1 (!%p360_p12), %1426, %v435_v19  }
  0x22   : > { %554 = vmatprep.subr.bf16.mxu0 (!%p360_p12), %v1427_v9  ;;  %v1432_v12 = vld [vmem:[%s368_s20 + $0x8] ss:$16 sps:$4 sm:$0xff] (!%p360_p12)   ;;  %627 = vmatprep.subr.bf16.mxu1 (!%p360_p12), %v1429_v10  ;;  %v1433_v13 = vld [vmem:[%s368_s20 + $0x24] ss:$16 sps:$4 sm:$0xff] (!%p360_p12)   ;;  %v1435_v14 = vld [vmem:[%s368_s20 + $0x2c] ss:$16 sps:$4 sm:$0xff] (!%p360_p12)  }
  0x23   : > { %555 = vmatpush1.bf16.msra.mxu0 (!%p360_p12), %v1431_v11  ;;  %628 = vmatpush1.bf16.msra.mxu1 (!%p360_p12), %v1432_v12  ;;  %v1437_v15 = vld [vmem:[%s368_s20 + $0x20] ss:$16 sps:$4 sm:$0xff] (!%p360_p12)   ;;  %v1438_v16 = vld [vmem:[%s368_s20 + $0x28] ss:$16 sps:$4 sm:$0xff] (!%p360_p12)   ;;  %p410_p13 = scmp.lt.s32.totalorder (!%p360_p12), %s1342_s30, 7  ;;  %s1341_s25 = sshll.u32 (!%p360_p12), %s1636_s12, 4 }
  0x24   : > { %556 = vmatprep.subr.bf16.mxu0 (!%p360_p12), %v1433_v13  ;;  %629 = vmatprep.subr.bf16.mxu1 (!%p360_p12), %v1435_v14  ;;  %v440_v26 = vld [vmem:[%s1816_s2 + $0x38] sm:$0xff] (!%p360_p12)  ;;  %v788_v27 = vld [vmem:[%s1818_s4] sm:$0xff] (!%p360_p12)  ;;  %v789_v28 = vld [vmem:[%s1818_s4 + $0x8] sm:$0xff] (!%p360_p12)  ;;  %s1384_s26 = sshll.u32 (!%p360_p12), %s1599_s17, 8  ;;  %s407_s27 = scalar_lea.vmem (!%p360_p12), [#allocation3], %s1341_s25 }
  0x25   : > { %448 = vperm.xlu0 (!%p360_p12), %1425, %v434_v20   ;;  %458 = vperm.xlu1 (!%p360_p12), %1426, %v436_v21   ;;  %v1441_v29 = vld [vmem:[%s1815_s1 + $0x10] sm:$0xff] (!%p360_p12)   ;;  %v791_v31 = vld [vmem:[%s1818_s4 + $0x18] sm:$0xff] (!%p360_p12)  ;;  %v792_v32 = vld [vmem:[%s1818_s4 + $0x20] sm:$0xff] (!%p360_p12)  ;;  %s1256_s28 = sshll.u32 (!%p360_p12), %s407_s27, 4  ;;  %s1242_s18 = scalar_lea.sflag (!%p360_p12), [#allocation4], %s1636_s12  ;;  %s1772_s28 = int_to_ptr.vmem [resolvable:$true] %s1256_s28 }
  0x26   : > { %v790_v30 = vld [vmem:[%s1818_s4 + $0x10] sm:$0xff]  ;;  %v793_v33 = vld [vmem:[%s1818_s4 + $0x28] sm:$0xff]  ;;  %v1442_v34 = vld [vmem:[%s1815_s1 + $0x18] sm:$0xff]   ;;  %s1832_s30 = smov (!%p410_p13, %s1342_s30), 7  ;;  %s1457_s20 = scalar_lea.vmem %s1772_s28, 256 }
  0x27   : > { %557 = vmatpush1.bf16.msra.mxu0 %v1437_v15  ;;  %630 = vmatpush1.bf16.msra.mxu1 %v1438_v16  ;;  %v794_v35 = vld [vmem:[%s1818_s4 + $0x30] sm:$0xff]  ;;  %v795_v36 = vld [vmem:[%s1818_s4 + $0x38] sm:$0xff]  ;;  %v1096_v37 = vld [vmem:[%s1820_s6] sm:$0xf]  ;;  %s1343_s11 = sshll.u32 %s1832_s30, 2  ;;  %p1458_p0 = scmp.ne.s32.totalorder %s1772_s28, %s1457_s20 }
  0x28   : > { %v1187_v38 = vld [vmem:[%s1821_s7] sm:$0xf]  ;;  %s413_s21 = scalar_lea.vmem %s1823_s9, %s1343_s11  ;;  %s1770_s11 = scalar_lea.hbm %s1824_s10, %s1384_s26 }
  0x29   : > { %463 = vperm.xlu0 %1425, %v437_v22   ;;  %468 = vperm.xlu1 %1426, %v438_v23   ;;  %v1201_v39 = vld [vmem:[%s1822_s8] sm:$0xf]  ;;  %p1459_p1 = pnand %p1458_p0, %p1617_p6  ;;  %s1522_s17 = smov [#allocation3]  }
  0x2a   : > { %1356 = vmatmul.mubr.msk.bf16.vlgmr.msra.gmra.mrb[0].mxu0 %vm541_vm0, %v1439_v18  ;;  %1360 = vmatmul.mubr.msk.bf16.vlgmr.msra.gmra.mrb[0].mxu1 %vm541_vm0, %v1439_v18 }
  0x2b   : > { %596 = vmatprep.mubr.bf16.mxu0 %v1521_v8  ;;  %669 = vmatprep.mubr.bf16.mxu1 %v1521_v8  ;;  %p1460_p2 = pneg %p1459_p1 }
  0x2d   : > { %473 = vperm.xlu0 %1425, %v439_v25   ;;  %478 = vperm.xlu1 %1426, %v440_v26  }
  0x31   : > { %798 = vperm.xlu0 %1425, %v788_v27   ;;  %803 = vperm.xlu1 %1426, %v789_v28  }
  0x32   : > { %1357 = vmatmul.mubr.msk.bf16.gmra.mrb[4].mxu0 %vm541_vm0, %v1440_v24  ;;  %1361 = vmatmul.mubr.msk.bf16.gmra.mrb[4].mxu1 %vm541_vm0, %v1440_v24 }
  0x33   : > { %606 = vmatprep.mubr.bf16.mxu0 %v1521_v8  ;;  %679 = vmatprep.mubr.bf16.mxu1 %v1521_v8 }
  0x35   : > { %808 = vperm.xlu0 %1425, %v790_v30   ;;  %813 = vperm.xlu1 %1426, %v791_v31  }
  0x39   : > { %818 = vperm.xlu0 %1425, %v792_v32   ;;  %823 = vperm.xlu1 %1426, %v793_v33  }
  0x3a   : > { %1358 = vmatmul.mubr.msk.bf16.gmra.mrb[8].mxu0 %vm541_vm0, %v1441_v29  ;;  %1362 = vmatmul.mubr.msk.bf16.gmra.mrb[8].mxu1 %vm541_vm0, %v1441_v29 }
  0x3b   : > { %616 = vmatprep.mubr.bf16.mxu0 %v1521_v8  ;;  %689 = vmatprep.mubr.bf16.mxu1 %v1521_v8 }
  0x3d   : > { %828 = vperm.xlu0 %1425, %v794_v35   ;;  %833 = vperm.xlu1 %1426, %v795_v36  }
  0x41   : > { %1099 = vperm.xlu0 %1425, %v1096_v37   ;;  %1194 = vperm.xlu1 %1426, %v1187_v38  }
  0x42   : > { %1359 = vmatmul.mubr.msk.bf16.gmra.mrb[12].mxu0 %vm541_vm0, %v1442_v34  ;;  %1363 = vmatmul.mubr.msk.bf16.gmra.mrb[12].mxu1 %vm541_vm0, %v1442_v34 }
  0x43   : > { %901 = vmatprep.mubr.bf16.mxu0 %v1521_v8  ;;  %974 = vmatprep.mubr.bf16.mxu1 %v1521_v8 }
  0x45   : > { %1204 = vperm.xlu0 %1425, %v1201_v39  }
  0xa0   : > { %v444_v40 = vpop.permute.xlu0 %443  ;;  %v454_v42 = vpop.permute.xlu1 %453 }
  0xa4   : > { %v449_v41 = vpop.permute.xlu0 %448  ;;  %v459_v3 = vpop.permute.xlu1 %458 }
  0xfd   : > { %v588_v43 = vpop.f32.mrb[0].mxu0  ;;  %v661_v44 = vpop.f32.mrb[0].mxu1 }
  0xfe   : > { %v589_v45 = vadd.f32 %v588_v43, %v444_v40  ;;  %v662_v46 = vadd.f32 %v661_v44, %v444_v40  ;;  %v590_v47 = vpop.f32.mrb[1].mxu0  ;;  %v663_v48 = vpop.f32.mrb[1].mxu1 }
  0xff   : > { %v591_v49 = vadd.f32 %v590_v47, %v444_v40  ;;  %v664_v50 = vadd.f32 %v663_v48, %v444_v40  ;;  %v592_v51 = vpop.f32.mrb[2].mxu0  ;;  %v665_v52 = vpop.f32.mrb[2].mxu1 }
 0x100   : > { %v700_v53 = vmul.f32 0.01, %v589_v45  ;;  %v702_v54 = vmul.f32 0.01, %v662_v46  ;;  %v593_v55 = vadd.f32 %v592_v51, %v449_v41  ;;  %v666_v56 = vadd.f32 %v665_v52, %v449_v41  ;;  %v594_v57 = vpop.f32.mrb[3].mxu0  ;;  %v667_v58 = vpop.f32.mrb[3].mxu1 }
 0x101   : > { %v701_v59 = vmul.f32 0.01, %v591_v49  ;;  %v703_v60 = vmul.f32 0.01, %v664_v50  ;;  %v595_v61 = vadd.f32 %v594_v57, %v449_v41  ;;  %v668_v62 = vadd.f32 %v667_v58, %v449_v41  ;;  %v464_v41 = vpop.permute.xlu0 %463 }
 0x102   : > { %v704_v63 = vmul.f32 0.01, %v593_v55  ;;  %v706_v0 = vmul.f32 0.01, %v666_v56  ;;  %v732_v4 = vmax.f32 %v589_v45, %v700_v53  ;;  %v734_v5 = vmax.f32 %v662_v46, %v702_v54 }
 0x103   : > { %v705_v1 = vmul.f32 0.01, %v595_v61  ;;  %v707_v2 = vmul.f32 0.01, %v668_v62  ;;  %v733_v9 = vmax.f32 %v591_v49, %v701_v59  ;;  %v735_v10 = vmax.f32 %v664_v50, %v703_v60 }
 0x104   : > { %v736_v6 = vmax.f32 %v593_v55, %v704_v63  ;;  %v738_v7 = vmax.f32 %v666_v56, %v706_v0 }
 0x105   : > { %v737_v11 = vmax.f32 %v595_v61, %v705_v1  ;;  %v739_v12 = vmax.f32 %v668_v62, %v707_v2  ;;  %v598_v13 = vpop.f32.mrb[4].mxu0  ;;  %v671_v14 = vpop.f32.mrb[4].mxu1 }
 0x106   : > { %v772_v15 = vpack.c.bf16 %v736_v6, %v732_v4  ;;  %v774_v16 = vpack.c.bf16 %v738_v7, %v734_v5  ;;  %v599_v17 = vadd.f32 %v598_v13, %v454_v42  ;;  %v672_v18 = vadd.f32 %v671_v14, %v454_v42  ;;  %v600_v19 = vpop.f32.mrb[5].mxu0  ;;  %v673_v20 = vpop.f32.mrb[5].mxu1 }
 0x107   : > { %v601_v21 = vadd.f32 %v600_v19, %v454_v42  ;;  %v674_v22 = vadd.f32 %v673_v20, %v454_v42  ;;  %v602_v23 = vpop.f32.mrb[6].mxu0  ;;  %v675_v24 = vpop.f32.mrb[6].mxu1  ;;  %v773_v25 = vpack.c.bf16 %v737_v11, %v733_v9  ;;  %v775_v26 = vpack.c.bf16 %v739_v12, %v735_v10 }
 0x108   : > { %v708_v27 = vmul.f32 0.01, %v599_v17  ;;  %v710_v28 = vmul.f32 0.01, %v672_v18  ;;  %v603_v29 = vadd.f32 %v602_v23, %v459_v3  ;;  %v676_v30 = vadd.f32 %v675_v24, %v459_v3  ;;  %v604_v31 = vpop.f32.mrb[7].mxu0  ;;  %v677_v32 = vpop.f32.mrb[7].mxu1 }
 0x109   : > { %v709_v33 = vmul.f32 0.01, %v601_v21  ;;  %v711_v34 = vmul.f32 0.01, %v674_v22  ;;  %v605_v35 = vadd.f32 %v604_v31, %v459_v3  ;;  %v678_v36 = vadd.f32 %v677_v32, %v459_v3  ;;  %869 = vmatprep.subr.bf16.mxu0 %v773_v25  ;;  %942 = vmatprep.subr.bf16.mxu1 %v775_v26  ;;  %v469_v42 = vpop.permute.xlu1 %468 }
 0x10a   : > { %v712_v37 = vmul.f32 0.01, %v603_v29  ;;  %v714_v38 = vmul.f32 0.01, %v676_v30  ;;  %870 = vmatpush1.bf16.msra.mxu0 %v772_v15  ;;  %943 = vmatpush1.bf16.msra.mxu1 %v774_v16  ;;  %v740_v43 = vmax.f32 %v599_v17, %v708_v27  ;;  %v742_v44 = vmax.f32 %v672_v18, %v710_v28  ;;  %v474_v16 = vpop.permute.xlu0 %473 }
 0x10b   : > { %v713_v39 = vmul.f32 0.01, %v605_v35  ;;  %v715_v40 = vmul.f32 0.01, %v678_v36  ;;  %v741_v47 = vmax.f32 %v601_v21, %v709_v33  ;;  %v743_v48 = vmax.f32 %v674_v22, %v711_v34 }
 0x10c   : > { %v744_v45 = vmax.f32 %v603_v29, %v712_v37  ;;  %v746_v46 = vmax.f32 %v676_v30, %v714_v38 }
 0x10d   : > { %v745_v49 = vmax.f32 %v605_v35, %v713_v39  ;;  %v747_v50 = vmax.f32 %v678_v36, %v715_v40  ;;  %v608_v51 = vpop.f32.mrb[8].mxu0  ;;  %v681_v52 = vpop.f32.mrb[8].mxu1 }
 0x10e   : > { %v776_v53 = vpack.c.bf16 %v744_v45, %v740_v43  ;;  %v778_v54 = vpack.c.bf16 %v746_v46, %v742_v44  ;;  %v609_v55 = vadd.f32 %v608_v51, %v464_v41  ;;  %v682_v56 = vadd.f32 %v681_v52, %v464_v41  ;;  %v610_v57 = vpop.f32.mrb[9].mxu0  ;;  %v683_v58 = vpop.f32.mrb[9].mxu1 }
 0x10f   : > { %v611_v59 = vadd.f32 %v610_v57, %v464_v41  ;;  %v684_v60 = vadd.f32 %v683_v58, %v464_v41  ;;  %v612_v61 = vpop.f32.mrb[10].mxu0  ;;  %v685_v62 = vpop.f32.mrb[10].mxu1  ;;  %v777_v63 = vpack.c.bf16 %v745_v49, %v741_v47  ;;  %v779_v0 = vpack.c.bf16 %v747_v50, %v743_v48 }
 0x110   : > { %v716_v1 = vmul.f32 0.01, %v609_v55  ;;  %v718_v2 = vmul.f32 0.01, %v682_v56  ;;  %v613_v3 = vadd.f32 %v612_v61, %v469_v42  ;;  %v686_v4 = vadd.f32 %v685_v62, %v469_v42  ;;  %v614_v5 = vpop.f32.mrb[11].mxu0  ;;  %v687_v6 = vpop.f32.mrb[11].mxu1 }
 0x111   : > { %v717_v7 = vmul.f32 0.01, %v611_v59  ;;  %v719_v9 = vmul.f32 0.01, %v684_v60  ;;  %v615_v10 = vadd.f32 %v614_v5, %v469_v42  ;;  %v688_v11 = vadd.f32 %v687_v6, %v469_v42  ;;  %871 = vmatprep.subr.bf16.mxu0 %v777_v63  ;;  %944 = vmatprep.subr.bf16.mxu1 %v779_v0  ;;  %v479_v17 = vpop.permute.xlu1 %478  ;;  %v1446_v5 = vld [vmem:[%s1817_s3 + $0x18] sm:$0xff]   ;;  %v799_v6 = vpop.permute.xlu0 %798 }
 0x112   : > { %v720_v12 = vmul.f32 0.01, %v613_v3  ;;  %v722_v13 = vmul.f32 0.01, %v686_v4  ;;  %872 = vmatpush1.bf16.msra.mxu0 %v776_v53  ;;  %945 = vmatpush1.bf16.msra.mxu1 %v778_v54  ;;  %v748_v18 = vmax.f32 %v609_v55, %v716_v1  ;;  %v750_v19 = vmax.f32 %v682_v56, %v718_v2  ;;  %v1443_v2 = vld [vmem:[%s1817_s3] sm:$0xff]  }
 0x113   : > { %v721_v14 = vmul.f32 0.01, %v615_v10  ;;  %v723_v15 = vmul.f32 0.01, %v688_v11  ;;  %v749_v22 = vmax.f32 %v611_v59, %v717_v7  ;;  %v751_v23 = vmax.f32 %v684_v60, %v719_v9 }
 0x114   : > { %v752_v20 = vmax.f32 %v613_v3, %v720_v12  ;;  %v754_v21 = vmax.f32 %v686_v4, %v722_v13  ;;  %v1444_v3 = vld [vmem:[%s1817_s3 + $0x8] sm:$0xff]   ;;  %v1445_v4 = vld [vmem:[%s1817_s3 + $0x10] sm:$0xff]  }
 0x115   : > { %v753_v24 = vmax.f32 %v615_v10, %v721_v14  ;;  %v755_v25 = vmax.f32 %v688_v11, %v723_v15  ;;  %v618_v26 = vpop.f32.mrb[12].mxu0  ;;  %v691_v27 = vpop.f32.mrb[12].mxu1 }
 0x116   : > { %v780_v28 = vpack.c.bf16 %v752_v20, %v748_v18  ;;  %v782_v29 = vpack.c.bf16 %v754_v21, %v750_v19  ;;  %v619_v30 = vadd.f32 %v618_v26, %v474_v16  ;;  %v692_v31 = vadd.f32 %v691_v27, %v474_v16  ;;  %v620_v32 = vpop.f32.mrb[13].mxu0  ;;  %v693_v33 = vpop.f32.mrb[13].mxu1 }
 0x117   : > { %v621_v34 = vadd.f32 %v620_v32, %v474_v16  ;;  %v694_v35 = vadd.f32 %v693_v33, %v474_v16  ;;  %v622_v36 = vpop.f32.mrb[14].mxu0  ;;  %v695_v37 = vpop.f32.mrb[14].mxu1  ;;  %v781_v38 = vpack.c.bf16 %v753_v24, %v749_v22  ;;  %v783_v39 = vpack.c.bf16 %v755_v25, %v751_v23 }
 0x118   : > { %v724_v40 = vmul.f32 0.01, %v619_v30  ;;  %v726_v41 = vmul.f32 0.01, %v692_v31  ;;  %v623_v42 = vadd.f32 %v622_v36, %v479_v17  ;;  %v696_v43 = vadd.f32 %v695_v37, %v479_v17  ;;  %v624_v44 = vpop.f32.mrb[15].mxu0  ;;  %v697_v45 = vpop.f32.mrb[15].mxu1 }
 0x119   : > { %v725_v46 = vmul.f32 0.01, %v621_v34  ;;  %v727_v47 = vmul.f32 0.01, %v694_v35  ;;  %v625_v48 = vadd.f32 %v624_v44, %v479_v17  ;;  %v698_v49 = vadd.f32 %v697_v45, %v479_v17  ;;  %873 = vmatprep.subr.bf16.mxu0 %v781_v38  ;;  %946 = vmatprep.subr.bf16.mxu1 %v783_v39  ;;  %v804_v7 = vpop.permute.xlu1 %803  ;;  %v809_v32 = vpop.permute.xlu0 %808 }
 0x11a   : > { %v728_v50 = vmul.f32 0.01, %v623_v42  ;;  %v730_v51 = vmul.f32 0.01, %v696_v43  ;;  %874 = vmatpush1.bf16.msra.mxu0 %v780_v28  ;;  %947 = vmatpush1.bf16.msra.mxu1 %v782_v29  ;;  %v756_v54 = vmax.f32 %v619_v30, %v724_v40  ;;  %v758_v55 = vmax.f32 %v692_v31, %v726_v41 }
 0x11b   : > { %v729_v52 = vmul.f32 0.01, %v625_v48  ;;  %v731_v53 = vmul.f32 0.01, %v698_v49  ;;  %v757_v58 = vmax.f32 %v621_v34, %v725_v46  ;;  %v759_v59 = vmax.f32 %v694_v35, %v727_v47 }
 0x11c   : > { %v760_v56 = vmax.f32 %v623_v42, %v728_v50  ;;  %v762_v57 = vmax.f32 %v696_v43, %v730_v51 }
 0x11d   : > { %v761_v60 = vmax.f32 %v625_v48, %v729_v52  ;;  %v763_v61 = vmax.f32 %v698_v49, %v731_v53  ;;  %v814_v33 = vpop.permute.xlu1 %813 }
 0x11e   : > { %v784_v62 = vpack.c.bf16 %v760_v56, %v756_v54  ;;  %v786_v63 = vpack.c.bf16 %v762_v57, %v758_v55 }
 0x11f   : > { %v785_v0 = vpack.c.bf16 %v761_v60, %v757_v58  ;;  %v787_v1 = vpack.c.bf16 %v763_v61, %v759_v59 }
 0x121   : > { %875 = vmatprep.subr.bf16.mxu0 %v785_v0  ;;  %948 = vmatprep.subr.bf16.mxu1 %v787_v1 }
 0x122   : > { %876 = vmatpush1.bf16.msra.mxu0 %v784_v62  ;;  %949 = vmatpush1.bf16.msra.mxu1 %v786_v63 }
 0x125   : > { %1368 = vmatmul.mubr.msk.bf16.vlgmr.msra.gmra.mrb[16].mxu0 %vm856_vm1, %v1443_v2  ;;  %1372 = vmatmul.mubr.msk.bf16.vlgmr.msra.gmra.mrb[16].mxu1 %vm856_vm1, %v1443_v2 }
 0x126   : > { %911 = vmatprep.mubr.bf16.mxu0 %v1521_v8  ;;  %984 = vmatprep.mubr.bf16.mxu1 %v1521_v8 }
 0x12d   : > { %1369 = vmatmul.mubr.msk.bf16.gmra.mrb[20].mxu0 %vm856_vm1, %v1444_v3  ;;  %1373 = vmatmul.mubr.msk.bf16.gmra.mrb[20].mxu1 %vm856_vm1, %v1444_v3 }
 0x12e   : > { %921 = vmatprep.mubr.bf16.mxu0 %v1521_v8  ;;  %994 = vmatprep.mubr.bf16.mxu1 %v1521_v8 }
 0x135   : > { %1370 = vmatmul.mubr.msk.bf16.gmra.mrb[24].mxu0 %vm856_vm1, %v1445_v4  ;;  %1374 = vmatmul.mubr.msk.bf16.gmra.mrb[24].mxu1 %vm856_vm1, %v1445_v4 }
 0x136   : > { %931 = vmatprep.mubr.bf16.mxu0 %v1521_v8  ;;  %1004 = vmatprep.mubr.bf16.mxu1 %v1521_v8 }
 0x13d   : > { %1371 = vmatmul.mubr.msk.bf16.gmra.mrb[28].mxu0 %vm856_vm1, %v1446_v5  ;;  %1375 = vmatmul.mubr.msk.bf16.gmra.mrb[28].mxu1 %vm856_vm1, %v1446_v5 }
 0x13e   : > { %1137 = vmatprep.mubr.bf16.mxu0 %v1521_v8  ;;  %1178 = vmatprep.mubr.bf16.mxu1 %v1521_v8 }
 0x1f8   : > { %v903_v9 = vpop.f32.mrb[16].mxu0  ;;  %v976_v10 = vpop.f32.mrb[16].mxu1 }
 0x1f9   : > { %v904_v11 = vadd.f32 %v903_v9, %v799_v6  ;;  %v977_v12 = vadd.f32 %v976_v10, %v799_v6  ;;  %v905_v13 = vpop.f32.mrb[17].mxu0  ;;  %v978_v14 = vpop.f32.mrb[17].mxu1 }
 0x1fa   : > { %v906_v15 = vadd.f32 %v905_v13, %v799_v6  ;;  %v979_v16 = vadd.f32 %v978_v14, %v799_v6  ;;  %v907_v17 = vpop.f32.mrb[18].mxu0  ;;  %v980_v18 = vpop.f32.mrb[18].mxu1 }
 0x1fb   : > { %v1015_v19 = vmul.f32 0.01, %v904_v11  ;;  %v1017_v20 = vmul.f32 0.01, %v977_v12  ;;  %v908_v21 = vadd.f32 %v907_v17, %v804_v7  ;;  %v981_v22 = vadd.f32 %v980_v18, %v804_v7  ;;  %v909_v23 = vpop.f32.mrb[19].mxu0  ;;  %v982_v24 = vpop.f32.mrb[19].mxu1 }
 0x1fc   : > { %v1016_v25 = vmul.f32 0.01, %v906_v15  ;;  %v1018_v8 = vmul.f32 0.01, %v979_v16  ;;  %v910_v26 = vadd.f32 %v909_v23, %v804_v7  ;;  %v983_v27 = vadd.f32 %v982_v24, %v804_v7  ;;  %v819_v6 = vpop.permute.xlu0 %818  ;;  %v824_v7 = vpop.permute.xlu1 %823 }
 0x1fd   : > { %v1019_v28 = vmul.f32 0.01, %v908_v21  ;;  %v1021_v29 = vmul.f32 0.01, %v981_v22  ;;  %v1047_v34 = vmax.f32 %v904_v11, %v1015_v19  ;;  %v1049_v35 = vmax.f32 %v977_v12, %v1017_v20 }
 0x1fe   : > { %v1020_v30 = vmul.f32 0.01, %v910_v26  ;;  %v1022_v31 = vmul.f32 0.01, %v983_v27  ;;  %v1048_v38 = vmax.f32 %v906_v15, %v1016_v25  ;;  %v1050_v39 = vmax.f32 %v979_v16, %v1018_v8 }
 0x1ff   : > { %v1051_v36 = vmax.f32 %v908_v21, %v1019_v28  ;;  %v1053_v37 = vmax.f32 %v981_v22, %v1021_v29 }
 0x200   : > { %v1052_v40 = vmax.f32 %v910_v26, %v1020_v30  ;;  %v1054_v41 = vmax.f32 %v983_v27, %v1022_v31  ;;  %v913_v42 = vpop.f32.mrb[20].mxu0  ;;  %v986_v43 = vpop.f32.mrb[20].mxu1 }
 0x201   : > { %v1080_v44 = vpack.c.bf16 %v1051_v36, %v1047_v34  ;;  %v1082_v45 = vpack.c.bf16 %v1053_v37, %v1049_v35  ;;  %v914_v46 = vadd.f32 %v913_v42, %v809_v32  ;;  %v987_v47 = vadd.f32 %v986_v43, %v809_v32  ;;  %v915_v48 = vpop.f32.mrb[21].mxu0  ;;  %v988_v49 = vpop.f32.mrb[21].mxu1 }
 0x202   : > { %v916_v50 = vadd.f32 %v915_v48, %v809_v32  ;;  %v989_v51 = vadd.f32 %v988_v49, %v809_v32  ;;  %v917_v52 = vpop.f32.mrb[22].mxu0  ;;  %v990_v53 = vpop.f32.mrb[22].mxu1  ;;  %v1081_v54 = vpack.c.bf16 %v1052_v40, %v1048_v38  ;;  %v1083_v55 = vpack.c.bf16 %v1054_v41, %v1050_v39 }
 0x203   : > { %v1023_v56 = vmul.f32 0.01, %v914_v46  ;;  %v1025_v57 = vmul.f32 0.01, %v987_v47  ;;  %v918_v58 = vadd.f32 %v917_v52, %v814_v33  ;;  %v991_v59 = vadd.f32 %v990_v53, %v814_v33  ;;  %v919_v60 = vpop.f32.mrb[23].mxu0  ;;  %v992_v61 = vpop.f32.mrb[23].mxu1 }
 0x204   : > { %v1024_v62 = vmul.f32 0.01, %v916_v50  ;;  %v1026_v63 = vmul.f32 0.01, %v989_v51  ;;  %v920_v0 = vadd.f32 %v919_v60, %v814_v33  ;;  %v993_v1 = vadd.f32 %v992_v61, %v814_v33  ;;  %1105 = vmatprep.subr.bf16.mxu0 %v1081_v54  ;;  %1146 = vmatprep.subr.bf16.mxu1 %v1083_v55 }
 0x205   : > { %v1027_v2 = vmul.f32 0.01, %v918_v58  ;;  %v1029_v3 = vmul.f32 0.01, %v991_v59  ;;  %1106 = vmatpush1.bf16.msra.mxu0 %v1080_v44  ;;  %1147 = vmatpush1.bf16.msra.mxu1 %v1082_v45  ;;  %v1055_v9 = vmax.f32 %v914_v46, %v1023_v56  ;;  %v1057_v10 = vmax.f32 %v987_v47, %v1025_v57  ;;  %v829_v44 = vpop.permute.xlu0 %828  ;;  %v834_v45 = vpop.permute.xlu1 %833 }
 0x206   : > { %v1028_v4 = vmul.f32 0.01, %v920_v0  ;;  %v1030_v5 = vmul.f32 0.01, %v993_v1  ;;  %v1056_v13 = vmax.f32 %v916_v50, %v1024_v62  ;;  %v1058_v14 = vmax.f32 %v989_v51, %v1026_v63 }
 0x207   : > { %v1059_v11 = vmax.f32 %v918_v58, %v1027_v2  ;;  %v1061_v12 = vmax.f32 %v991_v59, %v1029_v3 }
 0x208   : > { %v1060_v15 = vmax.f32 %v920_v0, %v1028_v4  ;;  %v1062_v16 = vmax.f32 %v993_v1, %v1030_v5  ;;  %v923_v17 = vpop.f32.mrb[24].mxu0  ;;  %v996_v18 = vpop.f32.mrb[24].mxu1 }
 0x209   : > { %v1084_v19 = vpack.c.bf16 %v1059_v11, %v1055_v9  ;;  %v1086_v20 = vpack.c.bf16 %v1061_v12, %v1057_v10  ;;  %v924_v21 = vadd.f32 %v923_v17, %v819_v6  ;;  %v997_v22 = vadd.f32 %v996_v18, %v819_v6  ;;  %v925_v23 = vpop.f32.mrb[25].mxu0  ;;  %v998_v24 = vpop.f32.mrb[25].mxu1 }
 0x20a   : > { %v926_v25 = vadd.f32 %v925_v23, %v819_v6  ;;  %v999_v8 = vadd.f32 %v998_v24, %v819_v6  ;;  %v927_v26 = vpop.f32.mrb[26].mxu0  ;;  %v1000_v27 = vpop.f32.mrb[26].mxu1  ;;  %v1085_v28 = vpack.c.bf16 %v1060_v15, %v1056_v13  ;;  %v1087_v29 = vpack.c.bf16 %v1062_v16, %v1058_v14 }
 0x20b   : > { %v1031_v30 = vmul.f32 0.01, %v924_v21  ;;  %v1033_v31 = vmul.f32 0.01, %v997_v22  ;;  %v928_v32 = vadd.f32 %v927_v26, %v824_v7  ;;  %v1001_v33 = vadd.f32 %v1000_v27, %v824_v7  ;;  %v929_v34 = vpop.f32.mrb[27].mxu0  ;;  %v1002_v35 = vpop.f32.mrb[27].mxu1 }
 0x20c   : > { %v1032_v36 = vmul.f32 0.01, %v926_v25  ;;  %v1034_v37 = vmul.f32 0.01, %v999_v8  ;;  %v930_v38 = vadd.f32 %v929_v34, %v824_v7  ;;  %v1003_v39 = vadd.f32 %v1002_v35, %v824_v7  ;;  %1107 = vmatprep.subr.bf16.mxu0 %v1085_v28  ;;  %1148 = vmatprep.subr.bf16.mxu1 %v1087_v29 }
 0x20d   : > { %v1035_v40 = vmul.f32 0.01, %v928_v32  ;;  %v1037_v41 = vmul.f32 0.01, %v1001_v33  ;;  %1108 = vmatpush1.bf16.msra.mxu0 %v1084_v19  ;;  %1149 = vmatpush1.bf16.msra.mxu1 %v1086_v20  ;;  %v1063_v46 = vmax.f32 %v924_v21, %v1031_v30  ;;  %v1065_v47 = vmax.f32 %v997_v22, %v1033_v31  ;;  %v1079_v30 = vld [vmem:[%s1819_s5] sm:$0x3]  ;;  %v1100_v31 = vpop.permute.xlu0 %1099 }
 0x20e   : > { %v1036_v42 = vmul.f32 0.01, %v930_v38  ;;  %v1038_v43 = vmul.f32 0.01, %v1003_v39  ;;  %v1064_v50 = vmax.f32 %v926_v25, %v1032_v36  ;;  %v1066_v51 = vmax.f32 %v999_v8, %v1034_v37 }
 0x20f   : > { %v1067_v48 = vmax.f32 %v928_v32, %v1035_v40  ;;  %v1069_v49 = vmax.f32 %v1001_v33, %v1037_v41 }
 0x210   : > { %v1068_v52 = vmax.f32 %v930_v38, %v1036_v42  ;;  %v1070_v53 = vmax.f32 %v1003_v39, %v1038_v43  ;;  %v933_v54 = vpop.f32.mrb[28].mxu0  ;;  %v1006_v55 = vpop.f32.mrb[28].mxu1 }
 0x211   : > { %v1088_v56 = vpack.c.bf16 %v1067_v48, %v1063_v46  ;;  %v1090_v57 = vpack.c.bf16 %v1069_v49, %v1065_v47  ;;  %v934_v58 = vadd.f32 %v933_v54, %v829_v44  ;;  %v1007_v59 = vadd.f32 %v1006_v55, %v829_v44  ;;  %v935_v60 = vpop.f32.mrb[29].mxu0  ;;  %v1008_v61 = vpop.f32.mrb[29].mxu1 }
 0x212   : > { %v936_v62 = vadd.f32 %v935_v60, %v829_v44  ;;  %v1009_v63 = vadd.f32 %v1008_v61, %v829_v44  ;;  %v937_v0 = vpop.f32.mrb[30].mxu0  ;;  %v1010_v1 = vpop.f32.mrb[30].mxu1  ;;  %v1089_v2 = vpack.c.bf16 %v1068_v52, %v1064_v50  ;;  %v1091_v3 = vpack.c.bf16 %v1070_v53, %v1066_v51  ;;  %v1211_v44 = vld [vmem:[%s413_s21] sm:$0xff] }
 0x213   : > { %v1039_v4 = vmul.f32 0.01, %v934_v58  ;;  %v1041_v5 = vmul.f32 0.01, %v1007_v59  ;;  %v938_v6 = vadd.f32 %v937_v0, %v834_v45  ;;  %v1011_v7 = vadd.f32 %v1010_v1, %v834_v45  ;;  %v939_v9 = vpop.f32.mrb[31].mxu0  ;;  %v1012_v10 = vpop.f32.mrb[31].mxu1 }
 0x214   : > { %v1040_v11 = vmul.f32 0.01, %v936_v62  ;;  %v1042_v12 = vmul.f32 0.01, %v1009_v63  ;;  %v940_v13 = vadd.f32 %v939_v9, %v834_v45  ;;  %v1013_v14 = vadd.f32 %v1012_v10, %v834_v45  ;;  %1109 = vmatprep.subr.bf16.mxu0 %v1089_v2  ;;  %1150 = vmatprep.subr.bf16.mxu1 %v1091_v3  ;;  %v1212_v45 = vld [vmem:[%s413_s21 + $0x8] sm:$0xff]  ;;  %v1195_v46 = vpop.permute.xlu1 %1194  ;;  %s1461_s21 = sshll.u32 %s1522_s17, 4  ;;  %s1462_s21 = int_to_ptr.vmem [resolvable:$false] %s1461_s21 }
 0x215   : > { %v1043_v15 = vmul.f32 0.01, %v938_v6  ;;  %v1045_v16 = vmul.f32 0.01, %v1011_v7  ;;  %1110 = vmatpush1.bf16.msra.mxu0 %v1088_v56  ;;  %1151 = vmatpush1.bf16.msra.mxu1 %v1090_v57  ;;  %v1071_v19 = vmax.f32 %v934_v58, %v1039_v4  ;;  %v1073_v20 = vmax.f32 %v1007_v59, %v1041_v5  ;;  %v1205_v56 = vpop.permute.xlu0 %1204  ;;  %s1463_s25 = scalar_lea.vmem %s1462_s21, 512  ;;  %p1464_p3 = scmp.lt.s32.totalorder %s1772_s28, %s1462_s21 }
 0x216   : > { %v1044_v17 = vmul.f32 0.01, %v940_v13  ;;  %v1046_v18 = vmul.f32 0.01, %v1013_v14  ;;  %v1072_v23 = vmax.f32 %v936_v62, %v1040_v11  ;;  %v1074_v24 = vmax.f32 %v1009_v63, %v1042_v12  ;;  %p1465_p4 = scmp.lt.s32.totalorder %s1463_s25, %s1457_s20 }
 0x217   : > { %v1075_v21 = vmax.f32 %v938_v6, %v1043_v15  ;;  %v1077_v22 = vmax.f32 %v1011_v7, %v1045_v16  ;;  %v1215_v47 = vcombine.high %v1211_v44, %v1211_v44  ;;  %v1216_v48 = vcombine.high %v1212_v45, %v1212_v45 }
 0x218   : > { %v1076_v25 = vmax.f32 %v940_v13, %v1044_v17  ;;  %v1078_v8 = vmax.f32 %v1013_v14, %v1046_v18  ;;  %v1219_v49 = vmul.f32 %v1211_v44, %v1195_v46  ;;  %v1221_v51 = vmul.f32 %v1212_v45, %v1195_v46  ;;  %p1466_p5 = por %p1465_p4, %p1464_p3 }
 0x219   : > { %v1092_v26 = vpack.c.bf16 %v1075_v21, %v1071_v19  ;;  %v1094_v27 = vpack.c.bf16 %v1077_v22, %v1073_v20  ;;  %v1220_v54 = vmul.f32 %v1215_v47, %v1195_v46  ;;  %v1222_v58 = vmul.f32 %v1216_v48, %v1195_v46 }
 0x21a   : > { %v1093_v28 = vpack.c.bf16 %v1076_v25, %v1072_v23  ;;  %v1095_v29 = vpack.c.bf16 %v1078_v8, %v1074_v24  ;;  %v1223_v62 = vmul.f32 0.05, %v1219_v49  ;;  %v1225_v1 = vmul.f32 0.05, %v1221_v51  ;;  %p1467_p7 = pnand %p1466_p5, %p1460_p2 }
 0x21b   : > { %v1224_v3 = vmul.f32 0.05, %v1220_v54  ;;  %v1226_v6 = vmul.f32 0.05, %v1222_v58 }
 0x21c   : > { %1111 = vmatprep.subr.bf16.mxu0 %v1093_v28  ;;  %1152 = vmatprep.subr.bf16.mxu1 %v1095_v29 }
 0x21d   : > { %1112 = vmatpush1.bf16.msra.mxu0 %v1092_v26  ;;  %1153 = vmatpush1.bf16.msra.mxu1 %v1094_v27 }
 0x220   : > { %1376 = vmatmul.mubr.msk.bf16.vlgmr.msra.gmra.mrb[32].mxu0 %vm856_vm1, %v1079_v30  ;;  %1377 = vmatmul.mubr.msk.bf16.vlgmr.msra.gmra.mrb[32].mxu1 %vm856_vm1, %v1079_v30 }
 0x2f3   : > { %v1139_v32 = vpop.f32.mrb[32].mxu0  ;;  %v1180_v33 = vpop.f32.mrb[32].mxu1 }
 0x2f4   : > { %v1140_v34 = vadd.f32 %v1139_v32, %v1100_v31  ;;  %v1181_v35 = vadd.f32 %v1180_v33, %v1100_v31  ;;  %v1141_v36 = vpop.f32.mrb[33].mxu0  ;;  %v1182_v37 = vpop.f32.mrb[33].mxu1 }
 0x2f5   : > { %v1142_v38 = vadd.f32 %v1141_v36, %v1100_v31  ;;  %v1183_v39 = vadd.f32 %v1182_v37, %v1100_v31  ;;  %v1143_v40 = vpop.f32.mrb[34].mxu0  ;;  %v1184_v41 = vpop.f32.mrb[34].mxu1 }
 0x2f6   : > { %1449 = vtanh.f32 %v1140_v34  ;;  %v1144_v42 = vpop.f32.mrb[35].mxu0  ;;  %v1185_v43 = vpop.f32.mrb[35].mxu1 }
 0x2f7   : > { %1451 = vtanh.f32 %v1181_v35 }
 0x2f8   : > { %1453 = vtanh.f32 %v1142_v38 }
 0x2f9   : > { %1455 = vtanh.f32 %v1183_v39 }
 0x300   : > { %v1450_v50 = vpop.eup %1449 }
 0x301   : > { %v1452_v52 = vpop.eup %1451  ;;  %v1197_v53 = vmul.f32 %v1450_v50, %v1195_v46 }
 0x302   : > { %v1454_v55 = vpop.eup %1453  ;;  %v1199_v57 = vmul.f32 %v1452_v52, %v1195_v46 }
 0x303   : > { %v1456_v59 = vpop.eup %1455  ;;  %v1198_v60 = vmul.f32 %v1454_v55, %v1195_v46  ;;  %v1207_v61 = vadd.f32 %v1205_v56, %v1197_v53 }
 0x304   : > { %v1200_v63 = vmul.f32 %v1456_v59, %v1195_v46  ;;  %v1209_v0 = vadd.f32 %v1205_v56, %v1199_v57 }
 0x305   : > { %v1208_v2 = vadd.f32 %v1205_v56, %v1198_v60  ;;  %v1227_v4 = vadd.f32 %v1223_v62, %v1207_v61 }
 0x306   : > { %v1210_v5 = vadd.f32 %v1205_v56, %v1200_v63  ;;  %v1229_v7 = vadd.f32 %v1225_v1, %v1209_v0 }
 0x307   : > { %v1228_v9 = vadd.f32 %v1224_v3, %v1208_v2 }
 0x308   : > { %v1230_v10 = vadd.f32 %v1226_v6, %v1210_v5 }
 0x309   : > { %v1235_v11 = vcombine.low %v1227_v4, %v1228_v9 }
 0x30a   : > { %v1236_v12 = vcombine.low %v1229_v7, %v1230_v10 }
 0x30b   : > { %1239 = vst [vmem:[%s407_s27] sm:$0xff] %v1235_v11 }
 0x30c   : > { %1240 = vst [vmem:[%s407_s27 + $0x8] sm:$0xff] %v1236_v12 }
 0x30d   : > { %1470 = shalt.err (!%p1467_p7)
}
 0x30e   : > { %s1471_s12 = scalar_lea.hbm %s1770_s11, 256  ;;  %s1475_s29 = scalar_lea.hbm %s1824_s10, 512 }
 0x30f   : > { %p1472_p10 = scmp.ne.s32.totalorder %s1770_s11, %s1471_s12  ;;  %p1476_p13 = scmp.lt.u32.totalorder %s1770_s11, %s1824_s10 }
 0x310   : > { %p1477_p0 = scmp.lt.u32.totalorder %s1475_s29, %s1471_s12  ;;  %p1479_p2 = scmp.lt.u32.totalorder %s1471_s12, %s1770_s11 }
 0x311   : > { %p1473_p11 = pnand %p1472_p10, %p1617_p6 }
 0x312   : > { %p1478_p1 = por %p1477_p0, %p1476_p13 }
 0x313   : > { %p1474_p12 = pneg %p1473_p11 }
 0x314   : > { %p1480_p3 = por %p1479_p2, %p1478_p1 }
 0x316   : > { %p1481_p4 = pnand %p1480_p3, %p1474_p12 }
 0x318   : > { %1484 = shalt.err (!%p1481_p4)
}
 0x319   : > { %1385 = dma.vmem_to_hbm [thread:$0]  (%p1617_p6), %s1772_s28, 256, %s1770_s11, %s1242_s18  }
 0x31a PF: > { %s1268_s20 = sand.u32 1, %s1507_s13   ;;  %p1388_p5 = pnand %p1335_p9, %p1621_p8 }
 0x31b   : > { %s1269_s21 = scalar_lea.sflag [#allocation4], %s1268_s20 }
 0x31c   : > { %1502 = dma.done.wait (!%p1388_p5), %s1269_s21, 256  }
 0x31d   : > { %1504 = vsyncadd (!%p1388_p5), %s1269_s21, 4294967040  ;;  %p20_p7 = scmp.ge.s32.totalorder %s1603_s19, 4   ;;  %s1827_s13 = smov %s1511_s14 }
 0x31e   : > { %s1828_s14 = smov %s1515_s15  ;;  %s1829_s15 = smov %s1615_s22 }
 0x31f   : > { %s1830_s16 = smov %s1603_s19  ;;  %22 = sbr.rel (!%p20_p7) target bundleno = 3 (0x3), region = 126 }
 0x326   :  { %1274 = vsyncpa [#allocation4], 1 }
 0x327   :  { %1276 = vsyncpa [#allocation4 + $0x1], 1 }

</bundles_post_ra>
